<compile_context>
chip_gen: v5e
topology: v5e:2x2
jax: 0.10.0
libtpu: 0.0.40
codegen_flags: <defaults>
</compile_context>

<pallas_src>
import jax
import jax.numpy as jnp
from jax.experimental import pallas as pl
from jax.experimental.pallas import tpu as pltpu

_LANE_WIDTH = 1024        # lane-dense slab width: multiple of 128 lanes
_TILE_ROWS = 512          # (512, 1024) f32 block = 2 MiB -> safe on v5e/v6e/v7x
_MIN_PALLAS_ELEMS = 1024  # below this, a kernel launch is pure overhead


def _round_up(a: int, b: int) -> int:
    return (a + b - 1) // b * b


def _add_one_kernel(x_ref, o_ref):
    # Elementwise hot path: output = input + 1
    o_ref[...] = x_ref[...] + jnp.asarray(1, dtype=o_ref.dtype)


def zmodel_forward(x):
    """JAX/Pallas equivalent of zModel.forward: returns x + 1.

    Accepts any shape (including 0-d scalars, matching the reference usage).
    """
    x = jnp.asarray(x)
    orig_shape = x.shape
    n = x.size

    # Short-circuit tiny inputs (e.g. the 0-d scalar in the reference usage):
    # a fused XLA add beats a kernel dispatch + DMA of a degenerate tile.
    if n < _MIN_PALLAS_ELEMS:
        return x + jnp.asarray(1, dtype=x.dtype)

    # Flatten to a lane-dense 2-D slab (rows, 1024), padding the tail so every
    # block is full and the (8, 128) tiling constraint is satisfied exactly.
    flat = x.reshape((-1,))
    n_lane_pad = _round_up(n, _LANE_WIDTH)
    rows = n_lane_pad // _LANE_WIDTH
    tile_rows = min(_TILE_ROWS, _round_up(rows, 8))   # multiple of 8 sublanes
    rows_pad = _round_up(rows, tile_rows)
    total_pad = rows_pad * _LANE_WIDTH
    if total_pad != n:
        flat = jnp.pad(flat, (0, total_pad - n))
    x2d = flat.reshape((rows_pad, _LANE_WIDTH))

    grid = (rows_pad // tile_rows,)

    out2d = pl.pallas_call(
        _add_one_kernel,
        out_shape=jax.ShapeDtypeStruct(x2d.shape, x2d.dtype),
        grid=grid,
        in_specs=[pl.BlockSpec((tile_rows, _LANE_WIDTH), lambda i: (i, 0))],
        out_specs=pl.BlockSpec((tile_rows, _LANE_WIDTH), lambda i: (i, 0)),
        compiler_params=pltpu.CompilerParams(
            dimension_semantics=("parallel",),      # shard grid across TCs (v7x)
            vmem_limit_bytes=32 * 1024 * 1024,      # headroom; <= physical on all gens
        ),
    )(x2d)

    # Strip padding and restore the caller's shape.
    return out2d.reshape((-1,))[:n].reshape(orig_shape)


if __name__ == "__main__":
    key = jax.random.PRNGKey(0)
    k_batch, k_big = jax.random.split(key)

    # Exact reference usage: x = torch.tensor(1.0); output = model(x)
    x_scalar = jnp.asarray(1.0, dtype=jnp.float32)
    out_scalar = jax.block_until_ready(zmodel_forward(x_scalar))
    assert out_scalar.shape == ()
    assert jnp.allclose(out_scalar, 2.0), out_scalar

    # Small batched input consistent with typical module usage -> kernel path.
    x_batch = jax.random.normal(k_batch, (2, 4, 16, 16), dtype=jnp.float32)
    out_batch = jax.block_until_ready(zmodel_forward(x_batch))
    assert out_batch.shape == x_batch.shape
    assert jnp.allclose(out_batch, x_batch + 1.0, atol=1e-6)

    # Odd-sized input that exercises padding + a multi-tile pipelined grid.
    x_big = jax.random.normal(k_big, (1027, 1024), dtype=jnp.float32)
    out_big = jax.block_until_ready(zmodel_forward(x_big))
    assert out_big.shape == x_big.shape
    assert jnp.allclose(out_big, x_big + 1.0, atol=1e-6)

    print("KERNEL_OK")
</pallas_src>

<mosaic_0001>
module attributes {stable_mosaic.version = 11 : i64} {
  func.func @_add_one_kernel(%arg0: i32, %arg1: memref<8x1024xf32, #tpu.memory_space<vmem>>, %arg2: memref<8x1024xf32, #tpu.memory_space<vmem>>) attributes {dimension_semantics = [#tpu.dimension_semantics<parallel>], iteration_bounds = array<i64: 1>, scalar_prefetch = 0 : i64, scratch_operands = 0 : i64, tpu.core_type = #tpu.core_type<tc>, window_params = [{transform_indices = @transform_0, window_bounds = array<i64: 8, 1024>}, {transform_indices = @transform_1, window_bounds = array<i64: 8, 1024>}]} {
    %c0 = arith.constant 0 : index
    %c0_0 = arith.constant 0 : index
    %0 = vector.load %arg1[%c0, %c0_0] : memref<8x1024xf32, #tpu.memory_space<vmem>>, vector<8x1024xf32>
    %cst = arith.constant 1.000000e+00 : f32
    %1 = vector.broadcast %cst : f32 to vector<8x1024xf32>
    %2 = arith.addf %0, %1 : vector<8x1024xf32>
    %c0_1 = arith.constant 0 : index
    %c0_2 = arith.constant 0 : index
    %3 = vector.load %arg2[%c0_1, %c0_2] : memref<8x1024xf32, #tpu.memory_space<vmem>>, vector<8x1024xf32>
    tpu.vector_store %arg2[%c0_1, %c0_2], %2 {strides = array<i32>} : memref<8x1024xf32, #tpu.memory_space<vmem>>, vector<8x1024xf32>,
    return
  }
  func.func @transform_0(%arg0: i32) -> (i32, i32) {
    %c0_i32 = arith.constant 0 : i32
    %c0_i32_0 = arith.constant 0 : i32
    return %arg0, %c0_i32 : i32, i32
  }
  func.func @transform_1(%arg0: i32) -> (i32, i32) {
    %c0_i32 = arith.constant 0 : i32
    %c0_i32_0 = arith.constant 0 : i32
    return %arg0, %c0_i32 : i32, i32
  }
}

</mosaic_0001>

<bundles_post_ra>
// kernel: tpu_custom_call.1
= control target key start
LH: loop header
LB: loop body
LE: loop exit
PB: predicated region body
PF: predicated region fallthrough
CT: control target
= control target key end

     0   :  { %6 = vsyncpa [#allocation3], 0  ;;  %s136_s0 = inlined_call_operand.hbm [shape: f32[8,1024], index: 0, kind: input, shape index: {}]   ;;  %s137_s1 = inlined_call_operand.hbm [shape: f32[8,1024], index: 1, kind: output, shape index: {}]  }
   0x1   :  { %7 = vsyncpa [#allocation4], 0  ;;  %s13_s8 = sshll.u32 %s136_s0, 4  ;;  %s118_s9 = smov [#allocation2]   ;;  %s14_s8 = int_to_ptr.hbm [resolvable:$true] %s13_s8 }
   0x2   :  { %s15_s10 = sshll.u32 %s118_s9, 4  ;;  %s16_s10 = int_to_ptr.vmem [resolvable:$true] %s15_s10 }
   0x3   :  { %18 = dma.hbm_to_vmem [thread:$0]  %s14_s8, 1024, %s16_s10, [#allocation3]  }
   0x4   :  { %114 = dma.done.wait [#allocation3], 1024  }
   0x5   :  { %115 = vsyncadd [#allocation3], 4294966272  ;;  %v23_v0 = vld [vmem:[#allocation2] sm:$0xff]  ;;  %v24_v1 = vld [vmem:[#allocation2 + $0x8] sm:$0xff]  ;;  %s119_s0 = smov [#allocation5]   ;;  %s54_s14 = sshll.u32 %s137_s1, 4  ;;  %s55_s14 = int_to_ptr.hbm [resolvable:$true] %s54_s14 }
   0x6   :  { %v25_v2 = vld [vmem:[#allocation2 + $0x10] sm:$0xff]  ;;  %v31_v3 = vadd.f32 1.0, %v23_v0  ;;  %v32_v4 = vadd.f32 1.0, %v24_v1  ;;  %v26_v6 = vld [vmem:[#allocation2 + $0x18] sm:$0xff]  ;;  %v27_v7 = vld [vmem:[#allocation2 + $0x20] sm:$0xff]  ;;  %s52_s11 = sshll.u32 %s119_s0, 4  ;;  %s53_s11 = int_to_ptr.vmem [resolvable:$true] %s52_s11 }
   0x7   :  { %v33_v5 = vadd.f32 1.0, %v25_v2  ;;  %v28_v8 = vld [vmem:[#allocation2 + $0x28] sm:$0xff]  ;;  %v34_v9 = vadd.f32 1.0, %v26_v6  ;;  %v29_v10 = vld [vmem:[#allocation2 + $0x30] sm:$0xff]  ;;  %v35_v11 = vadd.f32 1.0, %v27_v7  ;;  %v30_v12 = vld [vmem:[#allocation2 + $0x38] sm:$0xff] }
   0x8   :  { %39 = vst [vmem:[#allocation5] sm:$0xff] %v31_v3  ;;  %v36_v13 = vadd.f32 1.0, %v28_v8  ;;  %v37_v14 = vadd.f32 1.0, %v29_v10  ;;  %v38_v15 = vadd.f32 1.0, %v30_v12 }
   0x9   :  { %40 = vst [vmem:[#allocation5 + $0x8] sm:$0xff] %v32_v4 }
   0xa   :  { %41 = vst [vmem:[#allocation5 + $0x10] sm:$0xff] %v33_v5 }
   0xb   :  { %42 = vst [vmem:[#allocation5 + $0x18] sm:$0xff] %v34_v9 }
   0xc   :  { %43 = vst [vmem:[#allocation5 + $0x20] sm:$0xff] %v35_v11 }
   0xd   :  { %44 = vst [vmem:[#allocation5 + $0x28] sm:$0xff] %v36_v13 }
   0xe   :  { %45 = vst [vmem:[#allocation5 + $0x30] sm:$0xff] %v37_v14 }
   0xf   :  { %46 = vst [vmem:[#allocation5 + $0x38] sm:$0xff] %v38_v15 }
  0x10   :  { %57 = dma.vmem_to_hbm [thread:$0]  %s53_s11, 1024, %s55_s14, [#allocation4]  }
  0x11   :  { %116 = dma.done.wait [#allocation4], 1024  }
  0x12   :  { %117 = vsyncadd [#allocation4], 4294966272 }
  0x13   :  { %62 = vsyncpa [#allocation3], 1 }
  0x14   :  { %63 = vsyncpa [#allocation4], 1 }

</bundles_post_ra>
